<compile_context>
chip_gen: v5e
topology: v5e:2x2
jax: 0.10.0
libtpu: 0.0.40
codegen_flags: <defaults>
</compile_context>

<pallas_src>
import functools

import jax
import jax.numpy as jnp
from jax import lax
from jax.experimental import pallas as pl
from jax.experimental.pallas import tpu as pltpu


def _decoder_kernel(x_ref, h0_ref, c0_ref, wcat_ref, wih_ref, b_ref,
                    wlin_ref, blin_ref,
                    y_ref, hn_ref, cn_ref,
                    h_all_ref, *, seq_len, hidden, unroll):
    """Fused LSTM recurrence + Linear(H->1) head, single invocation.

    x_ref     : (T, B, 1)   raw decoder inputs (input_size == 1)
    h0_ref    : (1, B, H)   initial hidden state (from encoder)
    c0_ref    : (1, B, H)   initial cell state
    wcat_ref  : (H, 4H)     W_hh^T, gate order [i, f, g, o] along columns
    wih_ref   : (1, 4H)     W_ih as a row (input_size == 1)
    b_ref     : (1, 4H)     fused bias b_ih + b_hh
    wlin_ref  : (1, 1, H)   linear head weight (row vector)
    blin_ref  : (1, 1)      linear head bias
    y_ref     : (T, B)      head output (reshaped to (B,T,1) in the wrapper)
    hn_ref    : (1, B, H)   final h
    cn_ref    : (1, B, H)   final c
    h_all_ref : (T, B, H)   VMEM staging of all hidden states
    """
    H = hidden

    # Loop-invariant operands loaded once (hoisted out of the recurrence).
    w_cat = wcat_ref[...]        # (H, 4H) — one lane-dense MXU weight tile
    w_ih_row = wih_ref[...]      # (1, 4H)
    b_row = b_ref[...]           # (1, 4H)

    def step(t, carry):
        h_prev, c_prev = carry

        # Input projection for this step: (B,1) * (1,4H) + (1,4H) -> (B,4H).
        # Pure VPU work, hidden under the MXU/EUP latency of the serial chain.
        xp = x_ref[t] * w_ih_row + b_row

        # Fused gate pre-activations: ONE (B,H) @ (H,4H) MXU op per step.
        z = xp + jnp.dot(h_prev, w_cat, preferred_element_type=jnp.float32)

        # sigmoid(x) = 0.5*(tanh(x/2)+1): a single EUP push covers i/f/(g)/o.
        sig = 0.5 * (jnp.tanh(z * 0.5) + 1.0)
        i_gate = sig[:, 0 * H:1 * H]
        f_gate = sig[:, 1 * H:2 * H]
        o_gate = sig[:, 3 * H:4 * H]
        g_gate = jnp.tanh(z[:, 2 * H:3 * H])   # second EUP push

        c_new = f_gate * c_prev + i_gate * g_gate
        h_new = o_gate * jnp.tanh(c_new)       # third EUP push

        h_all_ref[t] = h_new                   # lane-dense (B, H) store
        return h_new, c_new

    h_fin, c_fin = lax.fori_loop(0, seq_len, step,
                                 (h0_ref[0], c0_ref[0]),
                                 unroll=unroll)

    # Final hidden state written once (not every timestep).
    hn_ref[0] = h_fin
    cn_ref[0] = c_fin

    # Output head: Linear(H -> 1) over all timesteps at once. One multiply +
    # lane reduction over the staged (T, B, H) hidden states, single store.
    # TODO(synk): if T/B grow, emit y lane-dense as (B, T) (or a 128-padded
    # slab) instead of (T, B) to avoid masked vst.msk partial stores.
    y = jnp.sum(h_all_ref[...] * wlin_ref[...], axis=-1) + blin_ref[...]
    y_ref[...] = y


def decoder_forward(x_input, h0, c0, params):
    """Pallas Decoder.forward.

    Args:
      x_input: (B, T, 1) float32
      h0, c0:  (1, B, H) float32  (encoder hidden states, n_layers == 1)
      params:  dict with PyTorch-shaped LSTM/Linear params (see init below)

    Returns:
      output: (B, T, 1), (h_n, c_n) each (1, B, H)
    """
    B, T, _ = x_input.shape
    H = h0.shape[-1]

    # Fused recurrence weights: z = h @ W_cat gives (B, 4H) with PyTorch gate
    # order [i, f, g, o] along the 4H axis (4H == 128 lanes at H == 32).
    w_cat = jnp.transpose(params["w_hh"]).astype(jnp.float32)        # (H, 4H)
    # TODO(synk): for H >= 128 (esp. v5e) cast h_prev/w_cat to bf16 for the
    # recurrence matmul, keeping f32 accumulation and f32 c/h state.

    w_ih_row = params["w_ih"].reshape(1, 4 * H).astype(jnp.float32)  # (1, 4H)
    b_row = (params["b_ih"] + params["b_hh"]).reshape(1, 4 * H).astype(jnp.float32)

    x_tb1 = jnp.transpose(x_input, (1, 0, 2)).astype(jnp.float32)    # (T, B, 1)

    w_lin_v = params["w_lin"].reshape(1, 1, H).astype(jnp.float32)   # (1, 1, H)
    b_lin = params["b_lin"].reshape(1, 1).astype(jnp.float32)        # (1, 1)

    # TODO(synk): for large B on v7x, add a leading "parallel" batch grid axis
    # (dimension_semantics=("parallel", ...)) to use both TensorCores;
    # pointless at B=2.
    # TODO(synk): if T grows so that (T,B,H) staging approaches tens of MiB,
    # switch x / h_all to a T-chunked BlockSpec pipeline instead of
    # whole-array VMEM residency (v7x has only 64 MiB physical VMEM).
    kernel = functools.partial(_decoder_kernel, seq_len=T, hidden=H,
                               unroll=min(T, 8))

    out_shapes = (
        jax.ShapeDtypeStruct((T, B), jnp.float32),    # linear head output
        jax.ShapeDtypeStruct((1, B, H), jnp.float32), # h_n
        jax.ShapeDtypeStruct((1, B, H), jnp.float32), # c_n
    )

    y_tb, h_n, c_n = pl.pallas_call(
        kernel,
        out_shape=out_shapes,
        # No grid: all operands are whole-array VMEM resident (<1 MiB here).
        scratch_shapes=[pltpu.VMEM((T, B, H), jnp.float32)],  # staged h_t
        compiler_params=pltpu.CompilerParams(
            vmem_limit_bytes=32 * 1024 * 1024),  # explicit, safe on v5e/v6e/v7x
    )(x_tb1, h0, c0, w_cat, w_ih_row, b_row, w_lin_v, b_lin)

    output = jnp.transpose(y_tb)[:, :, None]   # (B, T, 1)
    return output, (h_n, c_n)


def _reference_forward(x_input, h0, c0, params):
    """Pure-JAX reference (lax.scan LSTM) for validation."""
    H = h0.shape[-1]
    w_ih, w_hh = params["w_ih"], params["w_hh"]
    b = params["b_ih"] + params["b_hh"]

    def step(carry, x_t):
        h, c = carry
        z = x_t @ w_ih.T + h @ w_hh.T + b
        i = jax.nn.sigmoid(z[:, 0 * H:1 * H])
        f = jax.nn.sigmoid(z[:, 1 * H:2 * H])
        g = jnp.tanh(z[:, 2 * H:3 * H])
        o = jax.nn.sigmoid(z[:, 3 * H:4 * H])
        c = f * c + i * g
        h = o * jnp.tanh(c)
        return (h, c), h

    xs = jnp.swapaxes(x_input, 0, 1)          # (T, B, 1)
    (h_n, c_n), hs = jax.lax.scan(step, (h0[0], c0[0]), xs)
    lstm_out = jnp.swapaxes(hs, 0, 1)         # (B, T, H)
    out = lstm_out @ params["w_lin"].T + params["b_lin"]
    return out, (h_n[None], c_n[None])


def init_params(key, hidden_size):
    """Deterministic parameter init (PyTorch LSTM/Linear shapes)."""
    H = hidden_size
    k = 1.0 / jnp.sqrt(H)
    keys = jax.random.split(key, 6)
    return {
        "w_ih": jax.random.uniform(keys[0], (4 * H, 1), jnp.float32, -k, k),
        "w_hh": jax.random.uniform(keys[1], (4 * H, H), jnp.float32, -k, k),
        "b_ih": jax.random.uniform(keys[2], (4 * H,), jnp.float32, -k, k),
        "b_hh": jax.random.uniform(keys[3], (4 * H,), jnp.float32, -k, k),
        "w_lin": jax.random.uniform(keys[4], (1, H), jnp.float32, -k, k),
        "b_lin": jax.random.uniform(keys[5], (1,), jnp.float32, -k, k),
    }


if __name__ == "__main__":
    B, T, H = 2, 8, 32

    key = jax.random.PRNGKey(0)
    kx, kh, kc, kp = jax.random.split(key, 4)

    x_input = jax.random.normal(kx, (B, T, 1), jnp.float32)
    h0 = jax.random.normal(kh, (1, B, H), jnp.float32)
    c0 = jax.random.normal(kc, (1, B, H), jnp.float32)
    params = init_params(kp, H)

    out, (h_n, c_n) = decoder_forward(x_input, h0, c0, params)
    jax.block_until_ready((out, h_n, c_n))

    ref_out, (ref_h, ref_c) = _reference_forward(x_input, h0, c0, params)
    assert jnp.allclose(out, ref_out, atol=1e-5, rtol=1e-5)
    assert jnp.allclose(h_n, ref_h, atol=1e-5, rtol=1e-5)
    assert jnp.allclose(c_n, ref_c, atol=1e-5, rtol=1e-5)

    print("KERNEL_OK")
</pallas_src>

<mosaic_0001>
module attributes {stable_mosaic.version = 11 : i64} {
  func.func @_decoder_kernel(%arg0: memref<8x2x1xf32, #tpu.memory_space<vmem>>, %arg1: memref<1x2x32xf32, #tpu.memory_space<vmem>>, %arg2: memref<1x2x32xf32, #tpu.memory_space<vmem>>, %arg3: memref<32x128xf32, #tpu.memory_space<vmem>>, %arg4: memref<1x128xf32, #tpu.memory_space<vmem>>, %arg5: memref<1x128xf32, #tpu.memory_space<vmem>>, %arg6: memref<1x1x32xf32, #tpu.memory_space<vmem>>, %arg7: memref<1x1xf32, #tpu.memory_space<vmem>>, %arg8: memref<8x2xf32, #tpu.memory_space<vmem>>, %arg9: memref<1x2x32xf32, #tpu.memory_space<vmem>>, %arg10: memref<1x2x32xf32, #tpu.memory_space<vmem>>, %arg11: memref<8x2x32xf32, #tpu.memory_space<vmem>>) attributes {dimension_semantics = [], scalar_prefetch = 0 : i64, scratch_operands = 1 : i64, tpu.core_type = #tpu.core_type<tc>} {
    %c0 = arith.constant 0 : index
    %c0_0 = arith.constant 0 : index
    %0 = vector.load %arg3[%c0, %c0_0] : memref<32x128xf32, #tpu.memory_space<vmem>>, vector<32x128xf32>
    %c0_1 = arith.constant 0 : index
    %c0_2 = arith.constant 0 : index
    %1 = vector.load %arg4[%c0_1, %c0_2] : memref<1x128xf32, #tpu.memory_space<vmem>>, vector<1x128xf32>
    %c0_3 = arith.constant 0 : index
    %c0_4 = arith.constant 0 : index
    %2 = vector.load %arg5[%c0_3, %c0_4] : memref<1x128xf32, #tpu.memory_space<vmem>>, vector<1x128xf32>
    %c0_5 = arith.constant 0 : index
    %c0_6 = arith.constant 0 : index
    %c0_7 = arith.constant 0 : index
    %3 = vector.load %arg1[%c0_5, %c0_6, %c0_7] : memref<1x2x32xf32, #tpu.memory_space<vmem>>, vector<1x2x32xf32>
    %4 = vector.shape_cast %3 : vector<1x2x32xf32> to vector<2x32xf32>
    %c0_8 = arith.constant 0 : index
    %c0_9 = arith.constant 0 : index
    %c0_10 = arith.constant 0 : index
    %5 = vector.load %arg2[%c0_8, %c0_9, %c0_10] : memref<1x2x32xf32, #tpu.memory_space<vmem>>, vector<1x2x32xf32>
    %6 = vector.shape_cast %5 : vector<1x2x32xf32> to vector<2x32xf32>
    %c0_i32 = arith.constant 0 : i32
    %7 = arith.index_cast %c0_i32 : i32 to index
    %c0_11 = arith.constant 0 : index
    %c0_12 = arith.constant 0 : index
    %8 = vector.load %arg0[%7, %c0_11, %c0_12] : memref<8x2x1xf32, #tpu.memory_space<vmem>>, vector<1x2x1xf32>
    %9 = vector.shape_cast %8 : vector<1x2x1xf32> to vector<2x1xf32>
    %10 = vector.broadcast %9 : vector<2x1xf32> to vector<2x128xf32>
    %11 = vector.broadcast %1 : vector<1x128xf32> to vector<2x128xf32>
    %12 = arith.mulf %10, %11 : vector<2x128xf32>
    %13 = vector.broadcast %2 : vector<1x128xf32> to vector<2x128xf32>
    %14 = arith.addf %12, %13 : vector<2x128xf32>
    %cst = arith.constant dense<0.000000e+00> : vector<2x128xf32>
    %15 = tpu.matmul %4, %0, %cst {dimension_numbers = #tpu.dot_dimension_numbers<[1], [0], [0], [1], [0, 0, 1, 1], [], []>} : vector<2x32xf32>, vector<32x128xf32>, vector<2x128xf32> -> vector<2x128xf32>
    %16 = arith.addf %14, %15 : vector<2x128xf32>
    %cst_13 = arith.constant 5.000000e-01 : f32
    %17 = vector.broadcast %cst_13 : f32 to vector<2x128xf32>
    %18 = arith.mulf %16, %17 : vector<2x128xf32>
    %19 = math.tanh %18 : vector<2x128xf32>
    %cst_14 = arith.constant 1.000000e+00 : f32
    %20 = vector.broadcast %cst_14 : f32 to vector<2x128xf32>
    %21 = arith.addf %19, %20 : vector<2x128xf32>
    %cst_15 = arith.constant 5.000000e-01 : f32
    %22 = vector.broadcast %cst_15 : f32 to vector<2x128xf32>
    %23 = arith.mulf %22, %21 : vector<2x128xf32>
    %24 = vector.extract_strided_slice %23 {offsets = [0, 0], sizes = [2, 32], strides = [1, 1]} : vector<2x128xf32> to vector<2x32xf32>
    %25 = vector.extract_strided_slice %23 {offsets = [0, 32], sizes = [2, 32], strides = [1, 1]} : vector<2x128xf32> to vector<2x32xf32>
    %26 = vector.extract_strided_slice %23 {offsets = [0, 96], sizes = [2, 32], strides = [1, 1]} : vector<2x128xf32> to vector<2x32xf32>
    %27 = vector.extract_strided_slice %16 {offsets = [0, 64], sizes = [2, 32], strides = [1, 1]} : vector<2x128xf32> to vector<2x32xf32>
    %28 = math.tanh %27 : vector<2x32xf32>
    %29 = arith.mulf %25, %6 : vector<2x32xf32>
    %30 = arith.mulf %24, %28 : vector<2x32xf32>
    %31 = arith.addf %29, %30 : vector<2x32xf32>
    %32 = math.tanh %31 : vector<2x32xf32>
    %33 = arith.mulf %26, %32 : vector<2x32xf32>
    %34 = arith.index_cast %c0_i32 : i32 to index
    %c0_16 = arith.constant 0 : index
    %c0_17 = arith.constant 0 : index
    %35 = vector.load %arg11[%34, %c0_16, %c0_17] : memref<8x2x32xf32, #tpu.memory_space<vmem>>, vector<1x2x32xf32>
    %36 = vector.shape_cast %35 : vector<1x2x32xf32> to vector<2x32xf32>
    %37 = vector.shape_cast %33 : vector<2x32xf32> to vector<1x2x32xf32>
    tpu.vector_store %arg11[%34, %c0_16, %c0_17], %37 {strides = array<i32>} : memref<8x2x32xf32, #tpu.memory_space<vmem>>, vector<1x2x32xf32>,
    %c1_i32 = arith.constant 1 : i32
    %38 = arith.index_cast %c1_i32 : i32 to index
    %c0_18 = arith.constant 0 : index
    %c0_19 = arith.constant 0 : index
    %39 = vector.load %arg0[%38, %c0_18, %c0_19] : memref<8x2x1xf32, #tpu.memory_space<vmem>>, vector<1x2x1xf32>
    %40 = vector.shape_cast %39 : vector<1x2x1xf32> to vector<2x1xf32>
    %41 = vector.broadcast %40 : vector<2x1xf32> to vector<2x128xf32>
    %42 = vector.broadcast %1 : vector<1x128xf32> to vector<2x128xf32>
    %43 = arith.mulf %41, %42 : vector<2x128xf32>
    %44 = vector.broadcast %2 : vector<1x128xf32> to vector<2x128xf32>
    %45 = arith.addf %43, %44 : vector<2x128xf32>
    %cst_20 = arith.constant dense<0.000000e+00> : vector<2x128xf32>
    %46 = tpu.matmul %33, %0, %cst_20 {dimension_numbers = #tpu.dot_dimension_numbers<[1], [0], [0], [1], [0, 0, 1, 1], [], []>} : vector<2x32xf32>, vector<32x128xf32>, vector<2x128xf32> -> vector<2x128xf32>
    %47 = arith.addf %45, %46 : vector<2x128xf32>
    %cst_21 = arith.constant 5.000000e-01 : f32
    %48 = vector.broadcast %cst_21 : f32 to vector<2x128xf32>
    %49 = arith.mulf %47, %48 : vector<2x128xf32>
    %50 = math.tanh %49 : vector<2x128xf32>
    %cst_22 = arith.constant 1.000000e+00 : f32
    %51 = vector.broadcast %cst_22 : f32 to vector<2x128xf32>
    %52 = arith.addf %50, %51 : vector<2x128xf32>
    %cst_23 = arith.constant 5.000000e-01 : f32
    %53 = vector.broadcast %cst_23 : f32 to vector<2x128xf32>
    %54 = arith.mulf %53, %52 : vector<2x128xf32>
    %55 = vector.extract_strided_slice %54 {offsets = [0, 0], sizes = [2, 32], strides = [1, 1]} : vector<2x128xf32> to vector<2x32xf32>
    %56 = vector.extract_strided_slice %54 {offsets = [0, 32], sizes = [2, 32], strides = [1, 1]} : vector<2x128xf32> to vector<2x32xf32>
    %57 = vector.extract_strided_slice %54 {offsets = [0, 96], sizes = [2, 32], strides = [1, 1]} : vector<2x128xf32> to vector<2x32xf32>
    %58 = vector.extract_strided_slice %47 {offsets = [0, 64], sizes = [2, 32], strides = [1, 1]} : vector<2x128xf32> to vector<2x32xf32>
    %59 = math.tanh %58 : vector<2x32xf32>
    %60 = arith.mulf %56, %31 : vector<2x32xf32>
    %61 = arith.mulf %55, %59 : vector<2x32xf32>
    %62 = arith.addf %60, %61 : vector<2x32xf32>
    %63 = math.tanh %62 : vector<2x32xf32>
    %64 = arith.mulf %57, %63 : vector<2x32xf32>
    %65 = arith.index_cast %c1_i32 : i32 to index
    %c0_24 = arith.constant 0 : index
    %c0_25 = arith.constant 0 : index
    %66 = vector.load %arg11[%65, %c0_24, %c0_25] : memref<8x2x32xf32, #tpu.memory_space<vmem>>, vector<1x2x32xf32>
    %67 = vector.shape_cast %66 : vector<1x2x32xf32> to vector<2x32xf32>
    %68 = vector.shape_cast %64 : vector<2x32xf32> to vector<1x2x32xf32>
    tpu.vector_store %arg11[%65, %c0_24, %c0_25], %68 {strides = array<i32>} : memref<8x2x32xf32, #tpu.memory_space<vmem>>, vector<1x2x32xf32>,
    %c2_i32 = arith.constant 2 : i32
    %69 = arith.index_cast %c2_i32 : i32 to index
    %c0_26 = arith.constant 0 : index
    %c0_27 = arith.constant 0 : index
    %70 = vector.load %arg0[%69, %c0_26, %c0_27] : memref<8x2x1xf32, #tpu.memory_space<vmem>>, vector<1x2x1xf32>
    %71 = vector.shape_cast %70 : vector<1x2x1xf32> to vector<2x1xf32>
    %72 = vector.broadcast %71 : vector<2x1xf32> to vector<2x128xf32>
    %73 = vector.broadcast %1 : vector<1x128xf32> to vector<2x128xf32>
    %74 = arith.mulf %72, %73 : vector<2x128xf32>
    %75 = vector.broadcast %2 : vector<1x128xf32> to vector<2x128xf32>
    %76 = arith.addf %74, %75 : vector<2x128xf32>
    %cst_28 = arith.constant dense<0.000000e+00> : vector<2x128xf32>
    %77 = tpu.matmul %64, %0, %cst_28 {dimension_numbers = #tpu.dot_dimension_numbers<[1], [0], [0], [1], [0, 0, 1, 1], [], []>} : vector<2x32xf32>, vector<32x128xf32>, vector<2x128xf32> -> vector<2x128xf32>
    %78 = arith.addf %76, %77 : vector<2x128xf32>
    %cst_29 = arith.constant 5.000000e-01 : f32
    %79 = vector.broadcast %cst_29 : f32 to vector<2x128xf32>
    %80 = arith.mulf %78, %79 : vector<2x128xf32>
    %81 = math.tanh %80 : vector<2x128xf32>
    %cst_30 = arith.constant 1.000000e+00 : f32
    %82 = vector.broadcast %cst_30 : f32 to vector<2x128xf32>
    %83 = arith.addf %81, %82 : vector<2x128xf32>
    %cst_31 = arith.constant 5.000000e-01 : f32
    %84 = vector.broadcast %cst_31 : f32 to vector<2x128xf32>
    %85 = arith.mulf %84, %83 : vector<2x128xf32>
    %86 = vector.extract_strided_slice %85 {offsets = [0, 0], sizes = [2, 32], strides = [1, 1]} : vector<2x128xf32> to vector<2x32xf32>
    %87 = vector.extract_strided_slice %85 {offsets = [0, 32], sizes = [2, 32], strides = [1, 1]} : vector<2x128xf32> to vector<2x32xf32>
    %88 = vector.extract_strided_slice %85 {offsets = [0, 96], sizes = [2, 32], strides = [1, 1]} : vector<2x128xf32> to vector<2x32xf32>
    %89 = vector.extract_strided_slice %78 {offsets = [0, 64], sizes = [2, 32], strides = [1, 1]} : vector<2x128xf32> to vector<2x32xf32>
    %90 = math.tanh %89 : vector<2x32xf32>
    %91 = arith.mulf %87, %62 : vector<2x32xf32>
    %92 = arith.mulf %86, %90 : vector<2x32xf32>
    %93 = arith.addf %91, %92 : vector<2x32xf32>
    %94 = math.tanh %93 : vector<2x32xf32>
    %95 = arith.mulf %88, %94 : vector<2x32xf32>
    %96 = arith.index_cast %c2_i32 : i32 to index
    %c0_32 = arith.constant 0 : index
    %c0_33 = arith.constant 0 : index
    %97 = vector.load %arg11[%96, %c0_32, %c0_33] : memref<8x2x32xf32, #tpu.memory_space<vmem>>, vector<1x2x32xf32>
    %98 = vector.shape_cast %97 : vector<1x2x32xf32> to vector<2x32xf32>
    %99 = vector.shape_cast %95 : vector<2x32xf32> to vector<1x2x32xf32>
    tpu.vector_store %arg11[%96, %c0_32, %c0_33], %99 {strides = array<i32>} : memref<8x2x32xf32, #tpu.memory_space<vmem>>, vector<1x2x32xf32>,
    %c3_i32 = arith.constant 3 : i32
    %100 = arith.index_cast %c3_i32 : i32 to index
    %c0_34 = arith.constant 0 : index
    %c0_35 = arith.constant 0 : index
    %101 = vector.load %arg0[%100, %c0_34, %c0_35] : memref<8x2x1xf32, #tpu.memory_space<vmem>>, vector<1x2x1xf32>
    %102 = vector.shape_cast %101 : vector<1x2x1xf32> to vector<2x1xf32>
    %103 = vector.broadcast %102 : vector<2x1xf32> to vector<2x128xf32>
    %104 = vector.broadcast %1 : vector<1x128xf32> to vector<2x128xf32>
    %105 = arith.mulf %103, %104 : vector<2x128xf32>
    %106 = vector.broadcast %2 : vector<1x128xf32> to vector<2x128xf32>
    %107 = arith.addf %105, %106 : vector<2x128xf32>
    %cst_36 = arith.constant dense<0.000000e+00> : vector<2x128xf32>
    %108 = tpu.matmul %95, %0, %cst_36 {dimension_numbers = #tpu.dot_dimension_numbers<[1], [0], [0], [1], [0, 0, 1, 1], [], []>} : vector<2x32xf32>, vector<32x128xf32>, vector<2x128xf32> -> vector<2x128xf32>
    %109 = arith.addf %107, %108 : vector<2x128xf32>
    %cst_37 = arith.constant 5.000000e-01 : f32
    %110 = vector.broadcast %cst_37 : f32 to vector<2x128xf32>
    %111 = arith.mulf %109, %110 : vector<2x128xf32>
    %112 = math.tanh %111 : vector<2x128xf32>
    %cst_38 = arith.constant 1.000000e+00 : f32
    %113 = vector.broadcast %cst_38 : f32 to vector<2x128xf32>
    %114 = arith.addf %112, %113 : vector<2x128xf32>
    %cst_39 = arith.constant 5.000000e-01 : f32
    %115 = vector.broadcast %cst_39 : f32 to vector<2x128xf32>
    %116 = arith.mulf %115, %114 : vector<2x128xf32>
    %117 = vector.extract_strided_slice %116 {offsets = [0, 0], sizes = [2, 32], strides = [1, 1]} : vector<2x128xf32> to vector<2x32xf32>
    %118 = vector.extract_strided_slice %116 {offsets = [0, 32], sizes = [2, 32], strides = [1, 1]} : vector<2x128xf32> to vector<2x32xf32>
    %119 = vector.extract_strided_slice %116 {offsets = [0, 96], sizes = [2, 32], strides = [1, 1]} : vector<2x128xf32> to vector<2x32xf32>
    %120 = vector.extract_strided_slice %109 {offsets = [0, 64], sizes = [2, 32], strides = [1, 1]} : vector<2x128xf32> to vector<2x32xf32>
    %121 = math.tanh %120 : vector<2x32xf32>
    %122 = arith.mulf %118, %93 : vector<2x32xf32>
    %123 = arith.mulf %117, %121 : vector<2x32xf32>
    %124 = arith.addf %122, %123 : vector<2x32xf32>
    %125 = math.tanh %124 : vector<2x32xf32>
    %126 = arith.mulf %119, %125 : vector<2x32xf32>
    %127 = arith.index_cast %c3_i32 : i32 to index
    %c0_40 = arith.constant 0 : index
    %c0_41 = arith.constant 0 : index
    %128 = vector.load %arg11[%127, %c0_40, %c0_41] : memref<8x2x32xf32, #tpu.memory_space<vmem>>, vector<1x2x32xf32>
    %129 = vector.shape_cast %128 : vector<1x2x32xf32> to vector<2x32xf32>
    %130 = vector.shape_cast %126 : vector<2x32xf32> to vector<1x2x32xf32>
    tpu.vector_store %arg11[%127, %c0_40, %c0_41], %130 {strides = array<i32>} : memref<8x2x32xf32, #tpu.memory_space<vmem>>, vector<1x2x32xf32>,
    %c4_i32 = arith.constant 4 : i32
    %131 = arith.index_cast %c4_i32 : i32 to index
    %c0_42 = arith.constant 0 : index
    %c0_43 = arith.constant 0 : index
    %132 = vector.load %arg0[%131, %c0_42, %c0_43] : memref<8x2x1xf32, #tpu.memory_space<vmem>>, vector<1x2x1xf32>
    %133 = vector.shape_cast %132 : vector<1x2x1xf32> to vector<2x1xf32>
    %134 = vector.broadcast %133 : vector<2x1xf32> to vector<2x128xf32>
    %135 = vector.broadcast %1 : vector<1x128xf32> to vector<2x128xf32>
    %136 = arith.mulf %134, %135 : vector<2x128xf32>
    %137 = vector.broadcast %2 : vector<1x128xf32> to vector<2x128xf32>
    %138 = arith.addf %136, %137 : vector<2x128xf32>
    %cst_44 = arith.constant dense<0.000000e+00> : vector<2x128xf32>
    %139 = tpu.matmul %126, %0, %cst_44 {dimension_numbers = #tpu.dot_dimension_numbers<[1], [0], [0], [1], [0, 0, 1, 1], [], []>} : vector<2x32xf32>, vector<32x128xf32>, vector<2x128xf32> -> vector<2x128xf32>
    %140 = arith.addf %138, %139 : vector<2x128xf32>
    %cst_45 = arith.constant 5.000000e-01 : f32
    %141 = vector.broadcast %cst_45 : f32 to vector<2x128xf32>
    %142 = arith.mulf %140, %141 : vector<2x128xf32>
    %143 = math.tanh %142 : vector<2x128xf32>
    %cst_46 = arith.constant 1.000000e+00 : f32
    %144 = vector.broadcast %cst_46 : f32 to vector<2x128xf32>
    %145 = arith.addf %143, %144 : vector<2x128xf32>
    %cst_47 = arith.constant 5.000000e-01 : f32
    %146 = vector.broadcast %cst_47 : f32 to vector<2x128xf32>
    %147 = arith.mulf %146, %145 : vector<2x128xf32>
    %148 = vector.extract_strided_slice %147 {offsets = [0, 0], sizes = [2, 32], strides = [1, 1]} : vector<2x128xf32> to vector<2x32xf32>
    %149 = vector.extract_strided_slice %147 {offsets = [0, 32], sizes = [2, 32], strides = [1, 1]} : vector<2x128xf32> to vector<2x32xf32>
    %150 = vector.extract_strided_slice %147 {offsets = [0, 96], sizes = [2, 32], strides = [1, 1]} : vector<2x128xf32> to vector<2x32xf32>
    %151 = vector.extract_strided_slice %140 {offsets = [0, 64], sizes = [2, 32], strides = [1, 1]} : vector<2x128xf32> to vector<2x32xf32>
    %152 = math.tanh %151 : vector<2x32xf32>
    %153 = arith.mulf %149, %124 : vector<2x32xf32>
    %154 = arith.mulf %148, %152 : vector<2x32xf32>
    %155 = arith.addf %153, %154 : vector<2x32xf32>
    %156 = math.tanh %155 : vector<2x32xf32>
    %157 = arith.mulf %150, %156 : vector<2x32xf32>
    %158 = arith.index_cast %c4_i32 : i32 to index
    %c0_48 = arith.constant 0 : index
    %c0_49 = arith.constant 0 : index
    %159 = vector.load %arg11[%158, %c0_48, %c0_49] : memref<8x2x32xf32, #tpu.memory_space<vmem>>, vector<1x2x32xf32>
    %160 = vector.shape_cast %159 : vector<1x2x32xf32> to vector<2x32xf32>
    %161 = vector.shape_cast %157 : vector<2x32xf32> to vector<1x2x32xf32>
    tpu.vector_store %arg11[%158, %c0_48, %c0_49], %161 {strides = array<i32>} : memref<8x2x32xf32, #tpu.memory_space<vmem>>, vector<1x2x32xf32>,
    %c5_i32 = arith.constant 5 : i32
    %162 = arith.index_cast %c5_i32 : i32 to index
    %c0_50 = arith.constant 0 : index
    %c0_51 = arith.constant 0 : index
    %163 = vector.load %arg0[%162, %c0_50, %c0_51] : memref<8x2x1xf32, #tpu.memory_space<vmem>>, vector<1x2x1xf32>
    %164 = vector.shape_cast %163 : vector<1x2x1xf32> to vector<2x1xf32>
    %165 = vector.broadcast %164 : vector<2x1xf32> to vector<2x128xf32>
    %166 = vector.broadcast %1 : vector<1x128xf32> to vector<2x128xf32>
    %167 = arith.mulf %165, %166 : vector<2x128xf32>
    %168 = vector.broadcast %2 : vector<1x128xf32> to vector<2x128xf32>
    %169 = arith.addf %167, %168 : vector<2x128xf32>
    %cst_52 = arith.constant dense<0.000000e+00> : vector<2x128xf32>
    %170 = tpu.matmul %157, %0, %cst_52 {dimension_numbers = #tpu.dot_dimension_numbers<[1], [0], [0], [1], [0, 0, 1, 1], [], []>} : vector<2x32xf32>, vector<32x128xf32>, vector<2x128xf32> -> vector<2x128xf32>
    %171 = arith.addf %169, %170 : vector<2x128xf32>
    %cst_53 = arith.constant 5.000000e-01 : f32
    %172 = vector.broadcast %cst_53 : f32 to vector<2x128xf32>
    %173 = arith.mulf %171, %172 : vector<2x128xf32>
    %174 = math.tanh %173 : vector<2x128xf32>
    %cst_54 = arith.constant 1.000000e+00 : f32
    %175 = vector.broadcast %cst_54 : f32 to vector<2x128xf32>
    %176 = arith.addf %174, %175 : vector<2x128xf32>
    %cst_55 = arith.constant 5.000000e-01 : f32
    %177 = vector.broadcast %cst_55 : f32 to vector<2x128xf32>
    %178 = arith.mulf %177, %176 : vector<2x128xf32>
    %179 = vector.extract_strided_slice %178 {offsets = [0, 0], sizes = [2, 32], strides = [1, 1]} : vector<2x128xf32> to vector<2x32xf32>
    %180 = vector.extract_strided_slice %178 {offsets = [0, 32], sizes = [2, 32], strides = [1, 1]} : vector<2x128xf32> to vector<2x32xf32>
    %181 = vector.extract_strided_slice %178 {offsets = [0, 96], sizes = [2, 32], strides = [1, 1]} : vector<2x128xf32> to vector<2x32xf32>
    %182 = vector.extract_strided_slice %171 {offsets = [0, 64], sizes = [2, 32], strides = [1, 1]} : vector<2x128xf32> to vector<2x32xf32>
    %183 = math.tanh %182 : vector<2x32xf32>
    %184 = arith.mulf %180, %155 : vector<2x32xf32>
    %185 = arith.mulf %179, %183 : vector<2x32xf32>
    %186 = arith.addf %184, %185 : vector<2x32xf32>
    %187 = math.tanh %186 : vector<2x32xf32>
    %188 = arith.mulf %181, %187 : vector<2x32xf32>
    %189 = arith.index_cast %c5_i32 : i32 to index
    %c0_56 = arith.constant 0 : index
    %c0_57 = arith.constant 0 : index
    %190 = vector.load %arg11[%189, %c0_56, %c0_57] : memref<8x2x32xf32, #tpu.memory_space<vmem>>, vector<1x2x32xf32>
    %191 = vector.shape_cast %190 : vector<1x2x32xf32> to vector<2x32xf32>
    %192 = vector.shape_cast %188 : vector<2x32xf32> to vector<1x2x32xf32>
    tpu.vector_store %arg11[%189, %c0_56, %c0_57], %192 {strides = array<i32>} : memref<8x2x32xf32, #tpu.memory_space<vmem>>, vector<1x2x32xf32>,
    %c6_i32 = arith.constant 6 : i32
    %193 = arith.index_cast %c6_i32 : i32 to index
    %c0_58 = arith.constant 0 : index
    %c0_59 = arith.constant 0 : index
    %194 = vector.load %arg0[%193, %c0_58, %c0_59] : memref<8x2x1xf32, #tpu.memory_space<vmem>>, vector<1x2x1xf32>
    %195 = vector.shape_cast %194 : vector<1x2x1xf32> to vector<2x1xf32>
    %196 = vector.broadcast %195 : vector<2x1xf32> to vector<2x128xf32>
    %197 = vector.broadcast %1 : vector<1x128xf32> to vector<2x128xf32>
    %198 = arith.mulf %196, %197 : vector<2x128xf32>
    %199 = vector.broadcast %2 : vector<1x128xf32> to vector<2x128xf32>
    %200 = arith.addf %198, %199 : vector<2x128xf32>
    %cst_60 = arith.constant dense<0.000000e+00> : vector<2x128xf32>
    %201 = tpu.matmul %188, %0, %cst_60 {dimension_numbers = #tpu.dot_dimension_numbers<[1], [0], [0], [1], [0, 0, 1, 1], [], []>} : vector<2x32xf32>, vector<32x128xf32>, vector<2x128xf32> -> vector<2x128xf32>
    %202 = arith.addf %200, %201 : vector<2x128xf32>
    %cst_61 = arith.constant 5.000000e-01 : f32
    %203 = vector.broadcast %cst_61 : f32 to vector<2x128xf32>
    %204 = arith.mulf %202, %203 : vector<2x128xf32>
    %205 = math.tanh %204 : vector<2x128xf32>
    %cst_62 = arith.constant 1.000000e+00 : f32
    %206 = vector.broadcast %cst_62 : f32 to vector<2x128xf32>
    %207 = arith.addf %205, %206 : vector<2x128xf32>
    %cst_63 = arith.constant 5.000000e-01 : f32
    %208 = vector.broadcast %cst_63 : f32 to vector<2x128xf32>
    %209 = arith.mulf %208, %207 : vector<2x128xf32>
    %210 = vector.extract_strided_slice %209 {offsets = [0, 0], sizes = [2, 32], strides = [1, 1]} : vector<2x128xf32> to vector<2x32xf32>
    %211 = vector.extract_strided_slice %209 {offsets = [0, 32], sizes = [2, 32], strides = [1, 1]} : vector<2x128xf32> to vector<2x32xf32>
    %212 = vector.extract_strided_slice %209 {offsets = [0, 96], sizes = [2, 32], strides = [1, 1]} : vector<2x128xf32> to vector<2x32xf32>
    %213 = vector.extract_strided_slice %202 {offsets = [0, 64], sizes = [2, 32], strides = [1, 1]} : vector<2x128xf32> to vector<2x32xf32>
    %214 = math.tanh %213 : vector<2x32xf32>
    %215 = arith.mulf %211, %186 : vector<2x32xf32>
    %216 = arith.mulf %210, %214 : vector<2x32xf32>
    %217 = arith.addf %215, %216 : vector<2x32xf32>
    %218 = math.tanh %217 : vector<2x32xf32>
    %219 = arith.mulf %212, %218 : vector<2x32xf32>
    %220 = arith.index_cast %c6_i32 : i32 to index
    %c0_64 = arith.constant 0 : index
    %c0_65 = arith.constant 0 : index
    %221 = vector.load %arg11[%220, %c0_64, %c0_65] : memref<8x2x32xf32, #tpu.memory_space<vmem>>, vector<1x2x32xf32>
    %222 = vector.shape_cast %221 : vector<1x2x32xf32> to vector<2x32xf32>
    %223 = vector.shape_cast %219 : vector<2x32xf32> to vector<1x2x32xf32>
    tpu.vector_store %arg11[%220, %c0_64, %c0_65], %223 {strides = array<i32>} : memref<8x2x32xf32, #tpu.memory_space<vmem>>, vector<1x2x32xf32>,
    %c7_i32 = arith.constant 7 : i32
    %224 = arith.index_cast %c7_i32 : i32 to index
    %c0_66 = arith.constant 0 : index
    %c0_67 = arith.constant 0 : index
    %225 = vector.load %arg0[%224, %c0_66, %c0_67] : memref<8x2x1xf32, #tpu.memory_space<vmem>>, vector<1x2x1xf32>
    %226 = vector.shape_cast %225 : vector<1x2x1xf32> to vector<2x1xf32>
    %227 = vector.broadcast %226 : vector<2x1xf32> to vector<2x128xf32>
    %228 = vector.broadcast %1 : vector<1x128xf32> to vector<2x128xf32>
    %229 = arith.mulf %227, %228 : vector<2x128xf32>
    %230 = vector.broadcast %2 : vector<1x128xf32> to vector<2x128xf32>
    %231 = arith.addf %229, %230 : vector<2x128xf32>
    %cst_68 = arith.constant dense<0.000000e+00> : vector<2x128xf32>
    %232 = tpu.matmul %219, %0, %cst_68 {dimension_numbers = #tpu.dot_dimension_numbers<[1], [0], [0], [1], [0, 0, 1, 1], [], []>} : vector<2x32xf32>, vector<32x128xf32>, vector<2x128xf32> -> vector<2x128xf32>
    %233 = arith.addf %231, %232 : vector<2x128xf32>
    %cst_69 = arith.constant 5.000000e-01 : f32
    %234 = vector.broadcast %cst_69 : f32 to vector<2x128xf32>
    %235 = arith.mulf %233, %234 : vector<2x128xf32>
    %236 = math.tanh %235 : vector<2x128xf32>
    %cst_70 = arith.constant 1.000000e+00 : f32
    %237 = vector.broadcast %cst_70 : f32 to vector<2x128xf32>
    %238 = arith.addf %236, %237 : vector<2x128xf32>
    %cst_71 = arith.constant 5.000000e-01 : f32
    %239 = vector.broadcast %cst_71 : f32 to vector<2x128xf32>
    %240 = arith.mulf %239, %238 : vector<2x128xf32>
    %241 = vector.extract_strided_slice %240 {offsets = [0, 0], sizes = [2, 32], strides = [1, 1]} : vector<2x128xf32> to vector<2x32xf32>
    %242 = vector.extract_strided_slice %240 {offsets = [0, 32], sizes = [2, 32], strides = [1, 1]} : vector<2x128xf32> to vector<2x32xf32>
    %243 = vector.extract_strided_slice %240 {offsets = [0, 96], sizes = [2, 32], strides = [1, 1]} : vector<2x128xf32> to vector<2x32xf32>
    %244 = vector.extract_strided_slice %233 {offsets = [0, 64], sizes = [2, 32], strides = [1, 1]} : vector<2x128xf32> to vector<2x32xf32>
    %245 = math.tanh %244 : vector<2x32xf32>
    %246 = arith.mulf %242, %217 : vector<2x32xf32>
    %247 = arith.mulf %241, %245 : vector<2x32xf32>
    %248 = arith.addf %246, %247 : vector<2x32xf32>
    %249 = math.tanh %248 : vector<2x32xf32>
    %250 = arith.mulf %243, %249 : vector<2x32xf32>
    %251 = arith.index_cast %c7_i32 : i32 to index
    %c0_72 = arith.constant 0 : index
    %c0_73 = arith.constant 0 : index
    %252 = vector.load %arg11[%251, %c0_72, %c0_73] : memref<8x2x32xf32, #tpu.memory_space<vmem>>, vector<1x2x32xf32>
    %253 = vector.shape_cast %252 : vector<1x2x32xf32> to vector<2x32xf32>
    %254 = vector.shape_cast %250 : vector<2x32xf32> to vector<1x2x32xf32>
    tpu.vector_store %arg11[%251, %c0_72, %c0_73], %254 {strides = array<i32>} : memref<8x2x32xf32, #tpu.memory_space<vmem>>, vector<1x2x32xf32>,
    %c8_i32 = arith.constant 8 : i32
    %c0_74 = arith.constant 0 : index
    %c0_75 = arith.constant 0 : index
    %c0_76 = arith.constant 0 : index
    %255 = vector.load %arg9[%c0_74, %c0_75, %c0_76] : memref<1x2x32xf32, #tpu.memory_space<vmem>>, vector<1x2x32xf32>
    %256 = vector.shape_cast %255 : vector<1x2x32xf32> to vector<2x32xf32>
    %257 = vector.shape_cast %250 : vector<2x32xf32> to vector<1x2x32xf32>
    tpu.vector_store %arg9[%c0_74, %c0_75, %c0_76], %257 {strides = array<i32>} : memref<1x2x32xf32, #tpu.memory_space<vmem>>, vector<1x2x32xf32>,
    %c0_77 = arith.constant 0 : index
    %c0_78 = arith.constant 0 : index
    %c0_79 = arith.constant 0 : index
    %258 = vector.load %arg10[%c0_77, %c0_78, %c0_79] : memref<1x2x32xf32, #tpu.memory_space<vmem>>, vector<1x2x32xf32>
    %259 = vector.shape_cast %258 : vector<1x2x32xf32> to vector<2x32xf32>
    %260 = vector.shape_cast %248 : vector<2x32xf32> to vector<1x2x32xf32>
    tpu.vector_store %arg10[%c0_77, %c0_78, %c0_79], %260 {strides = array<i32>} : memref<1x2x32xf32, #tpu.memory_space<vmem>>, vector<1x2x32xf32>,
    %c0_80 = arith.constant 0 : index
    %c0_81 = arith.constant 0 : index
    %c0_82 = arith.constant 0 : index
    %261 = vector.load %arg11[%c0_80, %c0_81, %c0_82] : memref<8x2x32xf32, #tpu.memory_space<vmem>>, vector<8x2x32xf32>
    %c0_83 = arith.constant 0 : index
    %c0_84 = arith.constant 0 : index
    %c0_85 = arith.constant 0 : index
    %262 = vector.load %arg6[%c0_83, %c0_84, %c0_85] : memref<1x1x32xf32, #tpu.memory_space<vmem>>, vector<1x1x32xf32>
    %263 = vector.broadcast %262 : vector<1x1x32xf32> to vector<8x2x32xf32>
    %264 = arith.mulf %261, %263 : vector<8x2x32xf32>
    %cst_86 = arith.constant dense<0.000000e+00> : vector<8x2xf32>
    %265 = vector.multi_reduction <add>, %264, %cst_86 [2] : vector<8x2x32xf32> to vector<8x2xf32>
    %c0_87 = arith.constant 0 : index
    %c0_88 = arith.constant 0 : index
    %266 = vector.load %arg7[%c0_87, %c0_88] : memref<1x1xf32, #tpu.memory_space<vmem>>, vector<1x1xf32>
    %267 = vector.broadcast %266 : vector<1x1xf32> to vector<8x2xf32>
    %268 = arith.addf %265, %267 : vector<8x2xf32>
    %c0_89 = arith.constant 0 : index
    %c0_90 = arith.constant 0 : index
    %269 = vector.load %arg8[%c0_89, %c0_90] : memref<8x2xf32, #tpu.memory_space<vmem>>, vector<8x2xf32>
    tpu.vector_store %arg8[%c0_89, %c0_90], %268 {strides = array<i32>} : memref<8x2xf32, #tpu.memory_space<vmem>>, vector<8x2xf32>,
    return
  }
}

</mosaic_0001>

<bundles_post_ra>
// kernel: tpu_custom_call.1
= control target key start
LH: loop header
LB: loop body
LE: loop exit
PB: predicated region body
PF: predicated region fallthrough
CT: control target
= control target key end

     0   :  { %s1042_s0 = inlined_call_operand.vmem [shape: f32[8,2,1], index: 0, kind: input, shape index: {}]   ;;  %s1043_s1 = inlined_call_operand.vmem [shape: f32[1,2,32], index: 1, kind: input, shape index: {}]   ;;  %s1044_s2 = inlined_call_operand.vmem [shape: f32[1,2,32], index: 2, kind: input, shape index: {}]   ;;  %s1045_s3 = inlined_call_operand.hbm [shape: f32[32,128], index: 3, kind: input, shape index: {}]   ;;  %s1046_s4 = inlined_call_operand.vmem [shape: f32[1,128], index: 4, kind: input, shape index: {}]   ;;  %s1047_s5 = inlined_call_operand.vmem [shape: f32[1,128], index: 5, kind: input, shape index: {}]   ;;  %s1048_s6 = inlined_call_operand.vmem [shape: f32[1,1,32], index: 6, kind: input, shape index: {}]   ;;  %s1049_s7 = inlined_call_operand.<no memory space> [shape: f32[1,1], index: 7, kind: input, shape index: {}]   ;;  %s1050_s8 = inlined_call_operand.vmem [shape: f32[8,2], index: 8, kind: output, shape index: {0}]   ;;  %s1051_s9 = inlined_call_operand.hbm [shape: f32[1,2,32], index: 9, kind: output, shape index: {1}]   ;;  %s1052_s10 = inlined_call_operand.hbm [shape: f32[1,2,32], index: 10, kind: output, shape index: {2}]  }
   0x1   :  { %v16_v0 = vstv %s1049_s7 }
   0x2   :  { %17 = vst [vmem:[#allocation3] sm:$0x1] %v16_v0 }
   0x3   :  { %18 = vsyncpa [#allocation5], 0 }
   0x4   :  { %19 = vsyncpa [#allocation6], 0 }
   0x5   :  { %20 = vsyncpa [#allocation9], 0  ;;  %s31_s17 = sshll.u32 %s1045_s3, 4  ;;  %s845_s18 = smov [#allocation4]   ;;  %s32_s17 = int_to_ptr.hbm [resolvable:$true] %s31_s17 }
   0x6   :  { %s33_s19 = sshll.u32 %s845_s18, 4  ;;  %s846_s20 = smov 128   ;;  %s34_s19 = int_to_ptr.vmem [resolvable:$true] %s33_s19 }
   0x7   :  { %s847_s21 = smov 8  }
   0x8   :  { %39 = dma.hbm_to_vmem [thread:$0]  %s32_s17, 512, %s34_s19, [#allocation5], %s846_s20, %s846_s20, %s847_s21  }
   0x9   :  { %839 = dma.done.wait [#allocation5], 512  }
   0xa   :  { %840 = vsyncadd [#allocation5], 4294966784  ;;  %v848_v1 = vmov 0   ;;  %v55_v2 = vld [vmem:[#allocation4 + $0x18] sm:$0xff]  ;;  %v54_v3 = vld [vmem:[#allocation4 + $0x10] sm:$0xff]  ;;  %s849_s24 = smov 32  }
   0xb   :  { %712 = vset.pattern.permute.xlu0 %v848_v1  ;;  %713 = vset.pattern.permute.xlu2 %v848_v1  ;;  %v53_v4 = vld [vmem:[#allocation4 + $0x8] sm:$0xff]  ;;  %v52_v7 = vld [vmem:[#allocation4] sm:$0xff]  ;;  %vm74_vm0 = vcmask 261120   ;;  %s850_s29 = smov 64   ;;  %v689_v17 = vld [vmem:[%s1042_s0 + $0x2] sm:$0x3] }
   0xc   :  { %714 = vset.pattern.permute.xlu1 %v848_v1  ;;  %90 = vmatpush.msra.mxu0 %v55_v2  ;;  %v60_v5 = vld [vmem:[%s1042_s0] sm:$0x3]  ;;  %vm129_vm1 = vcmask 254976   ;;  %v691_v50 = vld [vmem:[%s1042_s0 + $0x4] sm:$0x3]  ;;  %s660_s25 = sshll.u32 %s1051_s9, 4  ;;  %s661_s25 = int_to_ptr.hbm [resolvable:$true] %s660_s25 }
   0xd   :  { %154 = vmatpush.msra.mxu1 %v55_v2  ;;  %63 = vperm.xlu0 %712, %v60_v5   ;;  %v59_v6 = vld [vmem:[%s1044_s2] sm:$0x3]  ;;  %s853_s26 = smov [#allocation8]   ;;  %s671_s28 = sshll.u32 %s1052_s10, 4  ;;  %vm634_vm2 = vcmask 1041409   ;;  %vm636_vm3 = vcmask 1042434   ;;  %s672_s28 = int_to_ptr.hbm [resolvable:$true] %s671_s28 }
   0xe   :  { %214 = vmatpush.msra.mxu2 %v55_v2  ;;  %91 = vmatpush.msra.mxu0 %v54_v3  ;;  %v58_v8 = vld [vmem:[%s1043_s1] sm:$0x3]  ;;  %s669_s1 = sshll.u32 %s853_s26, 4  ;;  %vm638_vm4 = vcmask 1043459   ;;  %vm640_vm5 = vcmask 1044484   ;;  %vm642_vm6 = vcmask 1045509   ;;  %s670_s1 = int_to_ptr.vmem [resolvable:$true] %s669_s1 }
   0xf   :  { %105 = vrot.lane.b32.xlu1 %v59_v6, %s849_s24  ;;  %155 = vmatpush.msra.mxu1 %v54_v3  ;;  %v929_v9 = vld [vmem:[%s1046_s4] ss:$0 sm:$0xff]  ;;  %v693_v6 = vld [vmem:[%s1042_s0 + $0x6] sm:$0x3]  ;;  %vm644_vm7 = vcmask 1046534   ;;  %vm646_vm8 = vcmask 1047559  }
  0x10   :  { %215 = vmatpush.msra.mxu2 %v54_v3  ;;  %92 = vmatpush.msra.mxu0 %v53_v4  ;;  %v935_v12 = vld [vmem:[%s1047_s5] ss:$0 sm:$0xff]  ;;  %vm649_vm9 = vcmask 15360  }
  0x11   :  { %274 = vmatpush.msra.mxu3 %v55_v2  ;;  %156 = vmatpush.msra.mxu1 %v53_v4 }
  0x12   :  { %216 = vmatpush.msra.mxu2 %v53_v4  ;;  %93 = vmatpush.msra.mxu0 %v52_v7 }
  0x13   :  { %275 = vmatpush.msra.mxu3 %v54_v3  ;;  %688 = vmatmul.msk.f32.vlgmr.msra.gmra.mxu0 %vm74_vm0, %v58_v8 }
  0x14   :  { %157 = vmatpush.msra.mxu1 %v52_v7  ;;  %217 = vmatpush.msra.mxu2 %v52_v7 }
  0x15   :  { %276 = vmatpush.msra.mxu3 %v53_v4  ;;  %334 = vmatpush.msrb.mxu0 %v55_v2 }
  0x16   :  { %394 = vmatpush.msrb.mxu1 %v55_v2  ;;  %454 = vmatpush.msrb.mxu2 %v55_v2 }
  0x17   :  { %277 = vmatpush.msra.mxu3 %v52_v7  ;;  %335 = vmatpush.msrb.mxu0 %v54_v3 }
  0x18   :  { %395 = vmatpush.msrb.mxu1 %v54_v3  ;;  %455 = vmatpush.msrb.mxu2 %v54_v3 }
  0x19   :  { %514 = vmatpush.msrb.mxu3 %v55_v2  ;;  %336 = vmatpush.msrb.mxu0 %v53_v4 }
  0x1a   :  { %396 = vmatpush.msrb.mxu1 %v53_v4  ;;  %456 = vmatpush.msrb.mxu2 %v53_v4 }
  0x1b   :  { %515 = vmatpush.msrb.mxu3 %v54_v3  ;;  %337 = vmatpush.msrb.mxu0 %v52_v7 }
  0x1c   :  { %397 = vmatpush.msrb.mxu1 %v52_v7  ;;  %457 = vmatpush.msrb.mxu2 %v52_v7 }
  0x1d   :  { %516 = vmatpush.msrb.mxu3 %v53_v4 }
  0x1f   :  { %517 = vmatpush.msrb.mxu3 %v52_v7 }
  0x7f   :  { %v64_v10 = vpop.permute.xlu0 %63 }
  0x80   :  { %v69_v11 = vmul.f32 %v929_v9, %v64_v10 }
  0x81   :  { %v106_v24 = vpop.permute.xlu1 %105 }
  0x82   :  { %v73_v13 = vadd.f32 %v935_v12, %v69_v11 }
  0x90   :  { %v95_v14 = vpop.f32.mrf.mxu0 }
  0x91   :  { %v98_v15 = vadd.f32 %v95_v14, %v73_v13 }
  0x93   :  { %719 = vtanh.f32 %v98_v15  ;;  %v99_v18 = vmul.f32 0.5, %v98_v15 }
  0x95   :  { %721 = vtanh.f32 %v99_v18 }
  0x99   :  { %v720_v16 = vpop.eup %719 }
  0x9a   :  { %110 = vrot.lane.b32.xlu0 %v720_v16, %s850_s29 }
  0x9b   :  { %v722_v19 = vpop.eup %721 }
  0x9c   :  { %v101_v20 = vadd.f32 1.0, %v722_v19 }
  0x9e   :  { %v102_v21 = vmul.f32 0.5, %v101_v20 }
  0xa0   :  { %v108_v25 = vmul.f32 %v106_v24, %v102_v21 }
  0xa2   :  { %135 = vperm.xlu0 %712, %v689_v17  }
 0x10c   :  { %v111_v22 = vpop.permute.xlu0 %110 }
 0x10d   :  { %v113_v23 = vmul.f32 %v111_v22, %v102_v21  ;;  %v695_v22 = vld [vmem:[%s1042_s0 + $0x8] sm:$0x3] }
 0x10f   :  { %115 = vrot.lane.b32.xlu1 %v113_v23, %s849_s24 }
 0x114   :  { %v136_v32 = vpop.permute.xlu0 %135 }
 0x115   :  { %v138_v33 = vmul.f32 %v929_v9, %v136_v32 }
 0x117   :  { %v139_v34 = vadd.f32 %v935_v12, %v138_v33 }
 0x181   :  { %v116_v26 = vpop.permute.xlu1 %115 }
 0x182   :  { %v118_v27 = vadd.f32 %v116_v26, %v108_v25 }
 0x184   :  { %723 = vtanh.f32 %v118_v27 }
 0x18a   :  { %v724_v28 = vpop.eup %723 }
 0x18b   :  { %121 = vrot.lane.b32.xlu2 %v724_v28, %s850_s29 }
 0x1e5   :  { %v122_v29 = vpop.permute.xlu2 %121 }
 0x1e6   :  { %v124_v30 = vmul.f32 %v122_v29, %v102_v21 }
 0x1e8   :  { %126 = vrot.lane.b32.xlu2 %v124_v30, %s849_s24 }
 0x242   :  { %v127_v31 = vpop.permute.xlu2 %126 }
 0x243   :  { %130 = vst.msk [vmem:[#allocation2] sm:$0x3] %vm129_vm1, %v127_v31  ;;  %690 = vmatmul.msk.f32.vlgmr.msra.gmra.mxu1 %vm74_vm0, %v127_v31 }
 0x2c0   :  { %v159_v35 = vpop.f32.mrf.mxu1 }
 0x2c1   :  { %v162_v36 = vadd.f32 %v159_v35, %v139_v34 }
 0x2c3   :  { %725 = vtanh.f32 %v162_v36  ;;  %v163_v38 = vmul.f32 0.5, %v162_v36 }
 0x2c5   :  { %727 = vtanh.f32 %v163_v38 }
 0x2c9   :  { %v726_v37 = vpop.eup %725 }
 0x2ca   :  { %170 = vrot.lane.b32.xlu1 %v726_v37, %s850_s29 }
 0x2cb   :  { %v728_v39 = vpop.eup %727 }
 0x2cc   :  { %v165_v40 = vadd.f32 1.0, %v728_v39 }
 0x2ce   :  { %v166_v41 = vmul.f32 0.5, %v165_v40 }
 0x2d0   :  { %v168_v44 = vmul.f32 %v166_v41, %v118_v27 }
 0x33c   :  { %v171_v42 = vpop.permute.xlu1 %170 }
 0x33d   :  { %v173_v43 = vmul.f32 %v171_v42, %v166_v41  ;;  %v697_v42 = vld [vmem:[%s1042_s0 + $0xa] sm:$0x3] }
 0x33f   :  { %175 = vrot.lane.b32.xlu2 %v173_v43, %s849_s24 }
 0x347   :  { %195 = vperm.xlu2 %713, %v691_v50  }
 0x399   :  { %v176_v45 = vpop.permute.xlu2 %175 }
 0x39a   :  { %v178_v46 = vadd.f32 %v176_v45, %v168_v44 }
 0x39c   :  { %729 = vtanh.f32 %v178_v46 }
 0x3a1   :  { %v196_v52 = vpop.permute.xlu2 %195 }
 0x3a2   :  { %v730_v47 = vpop.eup %729  ;;  %v198_v53 = vmul.f32 %v929_v9, %v196_v52 }
 0x3a3   :  { %181 = vrot.lane.b32.xlu0 %v730_v47, %s850_s29 }
 0x3a4   :  { %v199_v54 = vadd.f32 %v935_v12, %v198_v53 }
 0x415   :  { %v182_v48 = vpop.permute.xlu0 %181 }
 0x416   :  { %v184_v49 = vmul.f32 %v182_v48, %v166_v41 }
 0x418   :  { %186 = vrot.lane.b32.xlu1 %v184_v49, %s849_s24 }
 0x48a   :  { %v187_v51 = vpop.permute.xlu1 %186 }
 0x48b   :  { %190 = vst.msk [vmem:[#allocation2 + $0x2] sm:$0x3] %vm129_vm1, %v187_v51  ;;  %692 = vmatmul.msk.f32.vlgmr.msra.gmra.mxu2 %vm74_vm0, %v187_v51 }
 0x50e   :  { %v219_v55 = vpop.f32.mrf.mxu2 }
 0x50f   :  { %v222_v56 = vadd.f32 %v219_v55, %v199_v54 }
 0x511   :  { %731 = vtanh.f32 %v222_v56  ;;  %v223_v58 = vmul.f32 0.5, %v222_v56 }
 0x513   :  { %733 = vtanh.f32 %v223_v58 }
 0x517   :  { %v732_v57 = vpop.eup %731 }
 0x518   :  { %230 = vrot.lane.b32.xlu0 %v732_v57, %s850_s29 }
 0x519   :  { %v734_v59 = vpop.eup %733 }
 0x51a   :  { %v225_v60 = vadd.f32 1.0, %v734_v59 }
 0x51c   :  { %v226_v61 = vmul.f32 0.5, %v225_v60 }
 0x51e   :  { %v228_v0 = vmul.f32 %v226_v61, %v178_v46 }
 0x58a   :  { %v231_v62 = vpop.permute.xlu0 %230 }
 0x58b   :  { %v233_v63 = vmul.f32 %v231_v62, %v226_v61  ;;  %v699_v62 = vld [vmem:[%s1042_s0 + $0xc] sm:$0x3] }
 0x58d   :  { %235 = vrot.lane.b32.xlu1 %v233_v63, %s849_s24 }
 0x595   :  { %255 = vperm.xlu1 %714, %v693_v6  }
 0x5ff   :  { %v236_v1 = vpop.permute.xlu1 %235 }
 0x600   :  { %v238_v2 = vadd.f32 %v236_v1, %v228_v0 }
 0x602   :  { %735 = vtanh.f32 %v238_v2 }
 0x607   :  { %v256_v8 = vpop.permute.xlu1 %255 }
 0x608   :  { %v736_v3 = vpop.eup %735  ;;  %v258_v10 = vmul.f32 %v929_v9, %v256_v8 }
 0x609   :  { %241 = vrot.lane.b32.xlu2 %v736_v3, %s850_s29 }
 0x60a   :  { %v259_v11 = vadd.f32 %v935_v12, %v258_v10 }
 0x663   :  { %v242_v4 = vpop.permute.xlu2 %241 }
 0x664   :  { %v244_v5 = vmul.f32 %v242_v4, %v226_v61 }
 0x666   :  { %246 = vrot.lane.b32.xlu0 %v244_v5, %s849_s24 }
 0x6d8   :  { %v247_v7 = vpop.permute.xlu0 %246 }
 0x6d9   :  { %250 = vst.msk [vmem:[#allocation2 + $0x4] sm:$0x3] %vm129_vm1, %v247_v7  ;;  %694 = vmatmul.msk.f32.vlgmr.msra.gmra.mxu3 %vm74_vm0, %v247_v7 }
 0x75c   :  { %v279_v13 = vpop.f32.mrf.mxu3 }
 0x75d   :  { %v282_v14 = vadd.f32 %v279_v13, %v259_v11 }
 0x75f   :  { %737 = vtanh.f32 %v282_v14  ;;  %v283_v16 = vmul.f32 0.5, %v282_v14 }
 0x761   :  { %739 = vtanh.f32 %v283_v16 }
 0x765   :  { %v738_v15 = vpop.eup %737 }
 0x766   :  { %290 = vrot.lane.b32.xlu2 %v738_v15, %s850_s29 }
 0x767   :  { %v740_v17 = vpop.eup %739 }
 0x768   :  { %v285_v18 = vadd.f32 1.0, %v740_v17 }
 0x76a   :  { %v286_v19 = vmul.f32 0.5, %v285_v18 }
 0x76c   :  { %v288_v23 = vmul.f32 %v286_v19, %v238_v2 }
 0x7c0   :  { %v291_v20 = vpop.permute.xlu2 %290 }
 0x7c1   :  { %v293_v21 = vmul.f32 %v291_v20, %v286_v19  ;;  %v701_v20 = vld [vmem:[%s1042_s0 + $0xe] sm:$0x3]  ;;  %s851_s0 = smov 96  }
 0x7c3   :  { %295 = vrot.lane.b32.xlu0 %v293_v21, %s849_s24 }
 0x7cb   :  { %315 = vperm.xlu0 %712, %v695_v22  }
 0x835   :  { %v296_v24 = vpop.permute.xlu0 %295 }
 0x836   :  { %v298_v25 = vadd.f32 %v296_v24, %v288_v23 }
 0x838   :  { %741 = vtanh.f32 %v298_v25 }
 0x83d   :  { %v316_v30 = vpop.permute.xlu0 %315 }
 0x83e   :  { %v742_v26 = vpop.eup %741  ;;  %v318_v31 = vmul.f32 %v929_v9, %v316_v30 }
 0x83f   :  { %301 = vrot.lane.b32.xlu1 %v742_v26, %s850_s29 }
 0x840   :  { %v319_v32 = vadd.f32 %v935_v12, %v318_v31 }
 0x8b1   :  { %v302_v27 = vpop.permute.xlu1 %301 }
 0x8b2   :  { %v304_v28 = vmul.f32 %v302_v27, %v286_v19 }
 0x8b4   :  { %306 = vrot.lane.b32.xlu2 %v304_v28, %s849_s24 }
 0x90e   :  { %v307_v29 = vpop.permute.xlu2 %306 }
 0x90f   :  { %310 = vst.msk [vmem:[#allocation2 + $0x6] sm:$0x3] %vm129_vm1, %v307_v29  ;;  %696 = vmatmul.msk.f32.vlgmr.msrb.gmra.mxu0 %vm74_vm0, %v307_v29 }
 0x98c   :  { %v339_v33 = vpop.f32.mrf.mxu0 }
 0x98d   :  { %v342_v34 = vadd.f32 %v339_v33, %v319_v32 }
 0x98f   :  { %743 = vtanh.f32 %v342_v34  ;;  %v343_v36 = vmul.f32 0.5, %v342_v34 }
 0x991   :  { %745 = vtanh.f32 %v343_v36 }
 0x995   :  { %v744_v35 = vpop.eup %743 }
 0x996   :  { %350 = vrot.lane.b32.xlu1 %v744_v35, %s850_s29 }
 0x997   :  { %v746_v37 = vpop.eup %745 }
 0x998   :  { %v345_v38 = vadd.f32 1.0, %v746_v37 }
 0x99a   :  { %v346_v39 = vmul.f32 0.5, %v345_v38 }
 0x99c   :  { %v348_v43 = vmul.f32 %v346_v39, %v298_v25 }
 0xa08   :  { %v351_v40 = vpop.permute.xlu1 %350 }
 0xa09   :  { %v353_v41 = vmul.f32 %v351_v40, %v346_v39 }
 0xa0b   :  { %355 = vrot.lane.b32.xlu2 %v353_v41, %s849_s24 }
 0xa13   :  { %375 = vperm.xlu2 %713, %v697_v42   ;;  %v559_v42 = vld [vmem:[#allocation2 + $0x4] sm:$0x3] }
 0xa65   :  { %v356_v44 = vpop.permute.xlu2 %355 }
 0xa66   :  { %v358_v45 = vadd.f32 %v356_v44, %v348_v43  ;;  %v717_v43 = vld [vmem:[%s1048_s6] ss:$0 sm:$0xff]  ;;  %s852_s6 = smov [#allocation7]  }
 0xa67   :  { %v571_v44 = vmul.f32 %v717_v43, %v559_v42  ;;  %s658_s3 = sshll.u32 %s852_s6, 4  ;;  %s659_s3 = int_to_ptr.vmem [resolvable:$true] %s658_s3 }
 0xa68   :  { %747 = vtanh.f32 %v358_v45 }
 0xa6d   :  { %v376_v50 = vpop.permute.xlu2 %375 }
 0xa6e   :  { %v748_v46 = vpop.eup %747  ;;  %v378_v51 = vmul.f32 %v929_v9, %v376_v50 }
 0xa6f   :  { %361 = vrot.lane.b32.xlu0 %v748_v46, %s850_s29  ;;  %v557_v46 = vld [vmem:[#allocation2] sm:$0x3] }
 0xa70   :  { %v379_v52 = vadd.f32 %v935_v12, %v378_v51 }
 0xae1   :  { %v362_v47 = vpop.permute.xlu0 %361 }
 0xae2   :  { %v364_v48 = vmul.f32 %v362_v47, %v346_v39  ;;  %v569_v47 = vmul.f32 %v717_v43, %v557_v46 }
 0xae4   :  { %366 = vrot.lane.b32.xlu1 %v364_v48, %s849_s24  ;;  %v577_v48 = vsel %vm129_vm1, %v569_v47, 0.0 }
 0xb56   :  { %v367_v49 = vpop.permute.xlu1 %366 }
 0xb57   :  { %370 = vst.msk [vmem:[#allocation2 + $0x8] sm:$0x3] %vm129_vm1, %v367_v49  ;;  %698 = vmatmul.msk.f32.vlgmr.msrb.gmra.mxu1 %vm74_vm0, %v367_v49  ;;  %v560_v49 = vld [vmem:[#allocation2 + $0x6] sm:$0x3] }
 0xb58   :  { %v572_v50 = vmul.f32 %v717_v43, %v560_v49 }
 0xb5a   :  { %v586_v51 = vsel %vm129_vm1, %v572_v50, 0.0 }
 0xbd4   :  { %v399_v53 = vpop.f32.mrf.mxu1 }
 0xbd5   :  { %v402_v54 = vadd.f32 %v399_v53, %v379_v52 }
 0xbd7   :  { %749 = vtanh.f32 %v402_v54  ;;  %v403_v56 = vmul.f32 0.5, %v402_v54  ;;  %v718_v54 = vld [vmem:[#allocation3] ss:$0 sm:$0xff] }
 0xbd9   :  { %751 = vtanh.f32 %v403_v56 }
 0xbdd   :  { %v750_v55 = vpop.eup %749 }
 0xbde   :  { %410 = vrot.lane.b32.xlu0 %v750_v55, %s850_s29 }
 0xbdf   :  { %v752_v57 = vpop.eup %751 }
 0xbe0   :  { %v405_v58 = vadd.f32 1.0, %v752_v57 }
 0xbe2   :  { %v406_v59 = vmul.f32 0.5, %v405_v58 }
 0xbe4   :  { %v408_v63 = vmul.f32 %v406_v59, %v358_v45  ;;  %v583_v45 = vsel %vm129_vm1, %v571_v44, 0.0 }
 0xc50   :  { %v411_v60 = vpop.permute.xlu0 %410 }
 0xc51   :  { %v413_v61 = vmul.f32 %v411_v60, %v406_v59 }
 0xc53   :  { %415 = vrot.lane.b32.xlu1 %v413_v61, %s849_s24 }
 0xc5b   :  { %435 = vperm.xlu1 %714, %v699_v62   ;;  %v561_v62 = vld [vmem:[#allocation2 + $0x8] sm:$0x3] }
 0xcc5   :  { %v416_v0 = vpop.permute.xlu1 %415 }
 0xcc6   :  { %v418_v1 = vadd.f32 %v416_v0, %v408_v63  ;;  %v573_v63 = vmul.f32 %v717_v43, %v561_v62 }
 0xcc8   :  { %753 = vtanh.f32 %v418_v1  ;;  %v589_v0 = vsel %vm129_vm1, %v573_v63, 0.0 }
 0xccd   :  { %v436_v6 = vpop.permute.xlu1 %435 }
 0xcce   :  { %v754_v2 = vpop.eup %753  ;;  %v438_v7 = vmul.f32 %v929_v9, %v436_v6 }
 0xccf   :  { %421 = vrot.lane.b32.xlu2 %v754_v2, %s850_s29 }
 0xcd0   :  { %v439_v8 = vadd.f32 %v935_v12, %v438_v7 }
 0xd29   :  { %v422_v3 = vpop.permute.xlu2 %421 }
 0xd2a   :  { %v424_v4 = vmul.f32 %v422_v3, %v406_v59  ;;  %v558_v59 = vld [vmem:[#allocation2 + $0x2] sm:$0x3] }
 0xd2b   :  { %v570_v60 = vmul.f32 %v717_v43, %v558_v59 }
 0xd2c   :  { %426 = vrot.lane.b32.xlu0 %v424_v4, %s849_s24 }
 0xd2d   :  { %v580_v61 = vsel %vm129_vm1, %v570_v60, 0.0 }
 0xd9e   :  { %v427_v5 = vpop.permute.xlu0 %426 }
 0xd9f   :  { %430 = vst.msk [vmem:[#allocation2 + $0xa] sm:$0x3] %vm129_vm1, %v427_v5  ;;  %700 = vmatmul.msk.f32.vlgmr.msrb.gmra.mxu2 %vm74_vm0, %v427_v5 }
 0xda6   :  { %v562_v52 = vld [vmem:[#allocation2 + $0xa] sm:$0x3] }
 0xda7   :  { %v574_v53 = vmul.f32 %v717_v43, %v562_v52 }
 0xda9   :  { %v592_v55 = vsel %vm129_vm1, %v574_v53, 0.0 }
 0xe22   :  { %v459_v10 = vpop.f32.mrf.mxu2 }
 0xe23   :  { %v462_v11 = vadd.f32 %v459_v10, %v439_v8 }
 0xe25   :  { %755 = vtanh.f32 %v462_v11  ;;  %v463_v14 = vmul.f32 0.5, %v462_v11 }
 0xe27   :  { %757 = vtanh.f32 %v463_v14  ;;  %v624_v14 = vlaneseq }
 0xe2b   :  { %v756_v13 = vpop.eup %755 }
 0xe2c   :  { %470 = vrot.lane.b32.xlu2 %v756_v13, %s850_s29 }
 0xe2d   :  { %v758_v15 = vpop.eup %757 }
 0xe2e   :  { %v465_v16 = vadd.f32 1.0, %v758_v15 }
 0xe30   :  { %v466_v17 = vmul.f32 0.5, %v465_v16 }
 0xe32   :  { %v468_v21 = vmul.f32 %v466_v17, %v418_v1 }
 0xe86   :  { %v471_v18 = vpop.permute.xlu2 %470 }
 0xe87   :  { %v473_v19 = vmul.f32 %v471_v18, %v466_v17  ;;  %v625_v18 = vand.u32 127, %v624_v14 }
 0xe89   :  { %475 = vrot.lane.b32.xlu0 %v473_v19, %s849_s24 }
 0xe91   :  { %495 = vperm.xlu0 %712, %v701_v20  }
 0xefb   :  { %v476_v22 = vpop.permute.xlu0 %475 }
 0xefc   :  { %v478_v23 = vadd.f32 %v476_v22, %v468_v21 }
 0xefe   :  { %759 = vtanh.f32 %v478_v23 }
 0xf03   :  { %v496_v28 = vpop.permute.xlu0 %495 }
 0xf04   :  { %v760_v24 = vpop.eup %759  ;;  %v498_v29 = vmul.f32 %v929_v9, %v496_v28 }
 0xf05   :  { %481 = vrot.lane.b32.xlu1 %v760_v24, %s850_s29 }
 0xf06   :  { %v499_v30 = vadd.f32 %v935_v12, %v498_v29 }
 0xf77   :  { %v482_v25 = vpop.permute.xlu1 %481 }
 0xf78   :  { %v484_v26 = vmul.f32 %v482_v25, %v466_v17 }
 0xf7a   :  { %486 = vrot.lane.b32.xlu2 %v484_v26, %s849_s24 }
 0xfd4   :  { %v487_v27 = vpop.permute.xlu2 %486 }
 0xfd5   :  { %490 = vst.msk [vmem:[#allocation2 + $0xc] sm:$0x3] %vm129_vm1, %v487_v27  ;;  %702 = vmatmul.msk.f32.vlgmr.msrb.gmra.mxu3 %vm74_vm0, %v487_v27 }
 0xfdc   :  { %v563_v1 = vld [vmem:[#allocation2 + $0xc] sm:$0x3] }
 0xfdd   :  { %v575_v2 = vmul.f32 %v717_v43, %v563_v1 }
 0xfdf   :  { %v595_v3 = vsel %vm129_vm1, %v575_v2, 0.0 }
0x1058   :  { %v519_v31 = vpop.f32.mrf.mxu3 }
0x1059   :  { %v522_v32 = vadd.f32 %v519_v31, %v499_v30 }
0x105b   :  { %761 = vtanh.f32 %v522_v32  ;;  %v523_v34 = vmul.f32 0.5, %v522_v32 }
0x105d   :  { %763 = vtanh.f32 %v523_v34 }
0x1061   :  { %v762_v33 = vpop.eup %761 }
0x1062   :  { %530 = vrot.lane.b32.xlu1 %v762_v33, %s850_s29 }
0x1063   :  { %v764_v35 = vpop.eup %763 }
0x1064   :  { %v525_v36 = vadd.f32 1.0, %v764_v35 }
0x1066   :  { %v526_v37 = vmul.f32 0.5, %v525_v36 }
0x1068   :  { %v528_v40 = vmul.f32 %v526_v37, %v478_v23 }
0x10d4   :  { %v531_v38 = vpop.permute.xlu1 %530 }
0x10d5   :  { %v533_v39 = vmul.f32 %v531_v38, %v526_v37 }
0x10d7   :  { %535 = vrot.lane.b32.xlu2 %v533_v39, %s849_s24 }
0x1131   :  { %v536_v41 = vpop.permute.xlu2 %535 }
0x1132   :  { %v538_v9 = vadd.f32 %v536_v41, %v528_v40 }
0x1134   :  { %765 = vtanh.f32 %v538_v9  ;;  %553 = vrot.lane.b32.xlu2 %v538_v9, %s851_s0 }
0x113a   :  { %v766_v12 = vpop.eup %765 }
0x113b   :  { %541 = vrot.lane.b32.xlu0 %v766_v12, %s850_s29 }
0x115d   :  { %584 = vadd.xlane.f32.xlu2 %v583_v45 }
0x1165   :  { %578 = vadd.xlane.f32.xlu0 %v577_v48 }
0x116d   :  { %587 = vadd.xlane.f32.xlu0 %v586_v51 }
0x1175   :  { %605 = vperm.xlu2 %713, %v718_v54   ;;  %593 = vadd.xlane.f32.xlu0 %v592_v55 }
0x118e   :  { %v554_v56 = vpop.permute.xlu2 %553 }
0x118f   :  { %556 = vst.msk [vmem:[#allocation8] sm:$0x3] %vm129_vm1, %v554_v56 }
0x1190   :  { %674 = dma.vmem_to_hbm [thread:$0]  %s670_s1, 32, %s672_s28, [#allocation9]  }
0x11ad   :  { %v542_v57 = vpop.permute.xlu0 %541 }
0x11ae   :  { %v544_v58 = vmul.f32 %v542_v57, %v526_v37 }
0x11b0   :  { %546 = vrot.lane.b32.xlu1 %v544_v58, %s849_s24 }
0x11d0   :  { %v585_v11 = vpop.xlane.xlu2 %584 }
0x11d8   :  { %v579_v8 = vpop.xlane.xlu0 %578  ;;  %v606_v16 = vpop.permute.xlu2 %605 }
0x11d9   :  { %v608_v19 = vadd.f32 %v606_v16, %v579_v8  ;;  %v610_v21 = vadd.f32 %v606_v16, %v585_v11 }
0x11da   :  { %581 = vadd.xlane.f32.xlu1 %v580_v61 }
0x11db   :  { %v626_v22 = vperm.slane %v608_v19, %v625_v18  ;;  %v628_v28 = vperm.slane %v610_v21, %v625_v18 }
0x11e0   :  { %v588_v13 = vpop.xlane.xlu0 %587 }
0x11e1   :  { %v611_v25 = vadd.f32 %v606_v16, %v588_v13 }
0x11e2   :  { %590 = vadd.xlane.f32.xlu1 %v589_v0 }
0x11e3   :  { %v629_v32 = vperm.slane %v611_v25, %v625_v18 }
0x11e8   :  { %v594_v23 = vpop.xlane.xlu0 %593 }
0x11e9   :  { %v613_v33 = vadd.f32 %v606_v16, %v594_v23 }
0x11ea   :  { %596 = vadd.xlane.f32.xlu1 %v595_v3 }
0x11eb   :  { %v631_v38 = vperm.slane %v613_v33, %v625_v18 }
0x1222   :  { %v547_v4 = vpop.permute.xlu1 %546 }
0x1223   :  { %550 = vst.msk [vmem:[#allocation2 + $0xe] sm:$0x3] %vm129_vm1, %v547_v4 }
0x1224   :  { %551 = vst.msk [vmem:[#allocation7] sm:$0x3] %vm129_vm1, %v547_v4 }
0x1225   :  { %663 = dma.vmem_to_hbm [thread:$0]  %s659_s3, 32, %s661_s25, [#allocation6]  }
0x122a   :  { %v564_v5 = vld [vmem:[#allocation2 + $0xe] sm:$0x3] }
0x122b   :  { %v576_v6 = vmul.f32 %v717_v43, %v564_v5 }
0x122d   :  { %v598_v7 = vsel %vm129_vm1, %v576_v6, 0.0 }
0x122e   :  { %599 = vadd.xlane.f32.xlu0 %v598_v7 }
0x124d   :  { %v582_v10 = vpop.xlane.xlu1 %581 }
0x124e   :  { %v609_v17 = vadd.f32 %v606_v16, %v582_v10 }
0x1250   :  { %v627_v20 = vperm.slane %v609_v17, %v625_v18 }
0x1252   :  { %v635_v26 = vsel %vm634_vm2, %v627_v20, %v626_v22 }
0x1253   :  { %v637_v29 = vsel %vm636_vm3, %v628_v28, %v635_v26 }
0x1254   :  { %v639_v34 = vsel %vm638_vm4, %v629_v32, %v637_v29 }
0x1255   :  { %v591_v15 = vpop.xlane.xlu1 %590 }
0x1256   :  { %v612_v24 = vadd.f32 %v606_v16, %v591_v15 }
0x1258   :  { %v630_v30 = vperm.slane %v612_v24, %v625_v18 }
0x125a   :  { %v641_v35 = vsel %vm640_vm5, %v630_v30, %v639_v34 }
0x125b   :  { %v643_v40 = vsel %vm642_vm6, %v631_v38, %v641_v35 }
0x125d   :  { %v597_v27 = vpop.xlane.xlu1 %596 }
0x125e   :  { %v614_v31 = vadd.f32 %v606_v16, %v597_v27 }
0x1260   :  { %v632_v36 = vperm.slane %v614_v31, %v625_v18 }
0x1262   :  { %v645_v9 = vsel %vm644_vm7, %v632_v36, %v643_v40 }
0x12a1   :  { %v600_v37 = vpop.xlane.xlu0 %599 }
0x12a2   :  { %v615_v39 = vadd.f32 %v606_v16, %v600_v37 }
0x12a4   :  { %v633_v41 = vperm.slane %v615_v39, %v625_v18 }
0x12a6   :  { %v647_v12 = vsel %vm646_vm8, %v633_v41, %v645_v9 }
0x12a7   :  { %650 = vst.msk [vmem:[%s1050_s8] sm:$0xff] %vm649_vm9, %v647_v12 }
0x12a8   :  { %841 = dma.done.wait [#allocation6], 32  }
0x12a9   :  { %842 = vsyncadd [#allocation6], 4294967264 }
0x12aa   :  { %843 = dma.done.wait [#allocation9], 32  }
0x12ab   :  { %844 = vsyncadd [#allocation9], 4294967264 }
0x12ac   :  { %685 = vsyncpa [#allocation5], 1 }
0x12ad   :  { %686 = vsyncpa [#allocation6], 1 }
0x12ae   :  { %687 = vsyncpa [#allocation9], 1 }

</bundles_post_ra>
